<compile_context>
chip_gen: v7x
topology: tpu7x:2x2x1
jax: 0.10.0
libtpu: 0.0.40
codegen_flags: <defaults>
</compile_context>

<pallas_src>
import jax
import jax.numpy as jnp
from jax.experimental import pallas as pl
from jax.experimental.pallas import tpu as pltpu


def _make_triplet_kernel(margin: float):
    def kernel(a_ref, p_ref, n_ref, out_ref):
        a = a_ref[...].astype(jnp.float32)
        p = p_ref[...].astype(jnp.float32)
        n = n_ref[...].astype(jnp.float32)

        dp = a - p
        dn = a - n
        # Fused: (a-p)^2 - (a-n)^2 elementwise, then a single cross-lane reduce.
        d = dp * dp - dn * dn                         # (tm, D)  VPU only
        s = jnp.sum(d, axis=1, keepdims=True)         # (tm, 1)  one XLU reduce
        out_ref[...] = jnp.maximum(s + margin, 0.0)   # per-sample relu losses

    return kernel


def _choose_tiles(B: int, D: int, vmem_budget_bytes: int):
    """Pick the largest batch tile that keeps 3 inputs x 2 pipeline buffers of
    (tm, D) f32 under the budget; then even out tiles to minimize padding."""
    bytes_per_row = 3 * 2 * D * 4                     # 3 inputs, double-buffered
    tm_max = vmem_budget_bytes // bytes_per_row
    tm_max = max(8, min(2048, (tm_max // 8) * 8))     # sublane-aligned, capped
    num_tiles = pl.cdiv(B, tm_max)
    tm = min(tm_max, ((pl.cdiv(B, num_tiles) + 7) // 8) * 8)
    b_padded = num_tiles * tm
    return tm, num_tiles, b_padded


def triplet_loss(anchor, positive, negative, margin: float = 1.0,
                 vmem_budget_bytes: int = 8 * 1024 * 1024):
    """Pallas TripletLoss forward. anchor/positive/negative: (B, D)."""
    B, D = anchor.shape
    assert positive.shape == (B, D) and negative.shape == (B, D)

    tm, num_tiles, b_padded = _choose_tiles(B, D, vmem_budget_bytes)

    if b_padded != B:
        pad = ((0, b_padded - B), (0, 0))
        anchor = jnp.pad(anchor, pad)
        positive = jnp.pad(positive, pad)
        negative = jnp.pad(negative, pad)

    in_spec = pl.BlockSpec((tm, D), lambda i: (i, 0))
    out_spec = pl.BlockSpec((tm, 1), lambda i: (i, 0))   # one block per grid step

    per_sample = pl.pallas_call(
        _make_triplet_kernel(float(margin)),
        out_shape=jax.ShapeDtypeStruct((b_padded, 1), jnp.float32),
        grid_spec=pltpu.PrefetchScalarGridSpec(
            num_scalar_prefetch=0,
            grid=(num_tiles,),
            in_specs=[in_spec, in_spec, in_spec],
            out_specs=out_spec,
        ),
        compiler_params=pltpu.CompilerParams(
            dimension_semantics=("parallel",),   # independent tiles -> megacore
        ),
    )(anchor, positive, negative)

    # Final mean over the *valid* rows only (padded rows are discarded here).
    return jnp.sum(per_sample[:B, 0]) / B


def triplet_loss_ref(anchor, positive, negative, margin: float = 1.0):
    dp = jnp.sum((anchor - positive) ** 2, axis=1)
    dn = jnp.sum((anchor - negative) ** 2, axis=1)
    return jnp.mean(jnp.maximum(dp - dn + margin, 0.0))


if __name__ == "__main__":
    # TripletLoss has no learnable parameters; margin=1.0 as in __init__ default.
    key = jax.random.PRNGKey(0)
    ka, kp, kn = jax.random.split(key, 3)

    # Case 1: batch divides evenly into the chosen tile.
    B, D = 16, 128
    anchor = jax.random.normal(ka, (B, D), dtype=jnp.float32)
    positive = jax.random.normal(kp, (B, D), dtype=jnp.float32)
    negative = jax.random.normal(kn, (B, D), dtype=jnp.float32)

    out = jax.block_until_ready(triplet_loss(anchor, positive, negative, margin=1.0))
    ref = triplet_loss_ref(anchor, positive, negative, margin=1.0)
    assert jnp.allclose(out, ref, rtol=1e-5, atol=1e-5), (out, ref)

    # Case 2: ragged batch (exercises the padding path).
    B2 = 13
    a2 = jax.random.normal(ka, (B2, D), dtype=jnp.float32)
    p2 = jax.random.normal(kp, (B2, D), dtype=jnp.float32)
    n2 = jax.random.normal(kn, (B2, D), dtype=jnp.float32)
    out2 = jax.block_until_ready(triplet_loss(a2, p2, n2, margin=1.0))
    ref2 = triplet_loss_ref(a2, p2, n2, margin=1.0)
    assert jnp.allclose(out2, ref2, rtol=1e-5, atol=1e-5), (out2, ref2)

    print("KERNEL_OK")
</pallas_src>

<mosaic_0001>
module attributes {stable_mosaic.version = 11 : i64} {
  func.func @kernel(%arg0: i32, %arg1: memref<16x128xf32, #tpu.memory_space<vmem>>, %arg2: memref<16x128xf32, #tpu.memory_space<vmem>>, %arg3: memref<16x128xf32, #tpu.memory_space<vmem>>, %arg4: memref<16x1xf32, #tpu.memory_space<vmem>>) attributes {dimension_semantics = [#tpu.dimension_semantics<parallel>], iteration_bounds = array<i64: 1>, scalar_prefetch = 0 : i64, scratch_operands = 0 : i64, tpu.core_type = #tpu.core_type<tc>, window_params = [{transform_indices = @transform_0, window_bounds = array<i64: 16, 128>}, {transform_indices = @transform_1, window_bounds = array<i64: 16, 128>}, {transform_indices = @transform_2, window_bounds = array<i64: 16, 128>}, {transform_indices = @transform_3, window_bounds = array<i64: 16, 1>}]} {
    %c0 = arith.constant 0 : index
    %c0_0 = arith.constant 0 : index
    %0 = vector.load %arg1[%c0, %c0_0] : memref<16x128xf32, #tpu.memory_space<vmem>>, vector<16x128xf32>
    %c0_1 = arith.constant 0 : index
    %c0_2 = arith.constant 0 : index
    %1 = vector.load %arg2[%c0_1, %c0_2] : memref<16x128xf32, #tpu.memory_space<vmem>>, vector<16x128xf32>
    %c0_3 = arith.constant 0 : index
    %c0_4 = arith.constant 0 : index
    %2 = vector.load %arg3[%c0_3, %c0_4] : memref<16x128xf32, #tpu.memory_space<vmem>>, vector<16x128xf32>
    %3 = arith.subf %0, %1 : vector<16x128xf32>
    %4 = arith.subf %0, %2 : vector<16x128xf32>
    %5 = arith.mulf %3, %3 : vector<16x128xf32>
    %6 = arith.mulf %4, %4 : vector<16x128xf32>
    %7 = arith.subf %5, %6 : vector<16x128xf32>
    %cst = arith.constant dense<0.000000e+00> : vector<16xf32>
    %8 = vector.multi_reduction <add>, %7, %cst [1] : vector<16x128xf32> to vector<16xf32>
    %9 = vector.shape_cast %8 : vector<16xf32> to vector<16x1xf32>
    %cst_5 = arith.constant 1.000000e+00 : f32
    %10 = vector.broadcast %cst_5 : f32 to vector<16x1xf32>
    %11 = arith.addf %9, %10 : vector<16x1xf32>
    %cst_6 = arith.constant 0.000000e+00 : f32
    %12 = vector.broadcast %cst_6 : f32 to vector<16x1xf32>
    %13 = arith.maximumf %11, %12 : vector<16x1xf32>
    %c0_7 = arith.constant 0 : index
    %c0_8 = arith.constant 0 : index
    %14 = vector.load %arg4[%c0_7, %c0_8] : memref<16x1xf32, #tpu.memory_space<vmem>>, vector<16x1xf32>
    tpu.vector_store %arg4[%c0_7, %c0_8], %13 {strides = array<i32>} : memref<16x1xf32, #tpu.memory_space<vmem>>, vector<16x1xf32>,
    return
  }
  func.func @transform_0(%arg0: i32) -> (i32, i32) {
    %c0_i32 = arith.constant 0 : i32
    %c0_i32_0 = arith.constant 0 : i32
    return %arg0, %c0_i32 : i32, i32
  }
  func.func @transform_1(%arg0: i32) -> (i32, i32) {
    %c0_i32 = arith.constant 0 : i32
    %c0_i32_0 = arith.constant 0 : i32
    return %arg0, %c0_i32 : i32, i32
  }
  func.func @transform_2(%arg0: i32) -> (i32, i32) {
    %c0_i32 = arith.constant 0 : i32
    %c0_i32_0 = arith.constant 0 : i32
    return %arg0, %c0_i32 : i32, i32
  }
  func.func @transform_3(%arg0: i32) -> (i32, i32) {
    %c0_i32 = arith.constant 0 : i32
    %c0_i32_0 = arith.constant 0 : i32
    return %arg0, %c0_i32 : i32, i32
  }
}

</mosaic_0001>

<bundles_post_ra>
// kernel: tpu_custom_call.1
= control target key start
LH: loop header
LB: loop body
LE: loop exit
PB: predicated region body
PF: predicated region fallthrough
CT: control target
= control target key end

     0   :  { %8 = vsyncpa [#allocation3], 0  ;;  %s246_s0 = inlined_call_operand.hbm [shape: f32[16,128], index: 0, kind: input, shape index: {}]   ;;  %s247_s1 = inlined_call_operand.hbm [shape: f32[16,128], index: 1, kind: input, shape index: {}]   ;;  %s248_s2 = inlined_call_operand.hbm [shape: f32[16,128], index: 2, kind: input, shape index: {}]   ;;  %s249_s3 = inlined_call_operand.vmem [shape: f32[16,1], index: 3, kind: output, shape index: {}]  }
   0x1   :  { %9 = vsyncpa [#allocation5], 0  ;;  %s163_s12 = smov [#allocation4]   ;;  %s164_s14 = smov [#allocation2]  }
   0x2   :  { %s27_s13 = sshll.u32 %s163_s12, 4  ;;  %s15_s15 = sshll.u32 %s164_s14, 4  ;;  %s28_s13 = int_to_ptr.vmem [resolvable:$true] %s27_s13  ;;  %s188_s15 = int_to_ptr.vmem [resolvable:$true] %s15_s15 }
   0x3   :  { %s93_s18 = scalar_lea.hbm %s247_s1, 256 }
   0x4   :  { %p94_p0 = scmp.ne.s32.totalorder %s247_s1, %s93_s18  ;;  %p97_p1 = scmp.lt.u32.totalorder %s93_s18, %s247_s1 }
   0x6   :  { %p99_p2 = pnand %p97_p1, %p94_p0 }
   0x8   :  { %102 = shalt.err (!%p99_p2)
}
   0x9   :  { %s103_s23 = scalar_lea.vmem %s28_s13, 256  ;;  %p108_p4 = scmp.lt.s32.totalorder %s28_s13, %s28_s13 }
   0xa   :  { %p104_p3 = scmp.ne.s32.totalorder %s28_s13, %s103_s23  ;;  %p109_p5 = scmp.lt.s32.totalorder %s103_s23, %s103_s23 }
   0xc   :  { %p110_p6 = por %p109_p5, %p108_p4 }
   0xe   :  { %p111_p7 = pnand %p110_p6, %p104_p3 }
  0x10   :  { %114 = shalt.err (!%p111_p7)
}
  0x11   :  { %s165_s24 = smov 128   ;;  %s166_s25 = smov 8  }
  0x12   :  { %33 = dma.hbm_to_vmem [thread:$0]  %s247_s1, 256, %s28_s13, [#allocation5], %s165_s24, %s165_s24, %s166_s25  }
  0x13   :  { %s115_s30 = scalar_lea.hbm %s246_s0, 256 }
  0x14   :  { %p116_p8 = scmp.ne.s32.totalorder %s246_s0, %s115_s30  ;;  %p119_p9 = scmp.lt.u32.totalorder %s115_s30, %s246_s0 }
  0x16   :  { %p121_p10 = pnand %p119_p9, %p116_p8 }
  0x18   :  { %124 = shalt.err (!%p121_p10)
}
  0x19   :  { %s125_s8 = scalar_lea.vmem %s188_s15, 256  ;;  %p130_p12 = scmp.lt.s32.totalorder %s188_s15, %s188_s15 }
  0x1a   :  { %p126_p11 = scmp.ne.s32.totalorder %s188_s15, %s125_s8  ;;  %p131_p13 = scmp.lt.s32.totalorder %s125_s8, %s125_s8 }
  0x1c   :  { %p132_p0 = por %p131_p13, %p130_p12 }
  0x1e   :  { %p133_p1 = pnand %p132_p0, %p126_p11 }
  0x20   :  { %136 = shalt.err (!%p133_p1)
}
  0x21   :  { %21 = dma.hbm_to_vmem [thread:$0]  %s246_s0, 256, %s188_s15, [#allocation3], %s165_s24, %s165_s24, %s166_s25  }
  0x22   :  { %s167_s10 = smov [#allocation6]   ;;  %s137_s14 = scalar_lea.hbm %s248_s2, 256 }
  0x23   :  { %s39_s11 = sshll.u32 %s167_s10, 4  ;;  %p138_p2 = scmp.ne.s32.totalorder %s248_s2, %s137_s14  ;;  %s40_s11 = int_to_ptr.vmem [resolvable:$true] %s39_s11 }
  0x24   :  { %p141_p3 = scmp.lt.u32.totalorder %s137_s14, %s248_s2 }
  0x26   :  { %p143_p4 = pnand %p141_p3, %p138_p2 }
  0x28   :  { %146 = shalt.err (!%p143_p4)
}
  0x29   :  { %s147_s20 = scalar_lea.vmem %s40_s11, 256  ;;  %p152_p6 = scmp.lt.s32.totalorder %s40_s11, %s40_s11 }
  0x2a   :  { %p148_p5 = scmp.ne.s32.totalorder %s40_s11, %s147_s20  ;;  %p153_p7 = scmp.lt.s32.totalorder %s147_s20, %s147_s20 }
  0x2c   :  { %p154_p8 = por %p153_p7, %p152_p6 }
  0x2e   :  { %p155_p9 = pnand %p154_p8, %p148_p5 }
  0x30   :  { %158 = shalt.err (!%p155_p9)
}
  0x31   :  { %45 = dma.hbm_to_vmem [thread:$0]  %s248_s2, 256, %s40_s11, [#allocation5], %s165_s24, %s165_s24, %s166_s25  }
  0x32   :  { %159 = dma.done.wait [#allocation3], 256  }
  0x33   :  { %160 = vsyncadd [#allocation3], 4294967040 }
  0x34   :  { %161 = dma.done.wait [#allocation5], 512  }
  0x35   :  { %162 = vsyncadd [#allocation5], 4294966784  ;;  %v55_v0 = vld [vmem:[#allocation2] sm:$0xff]  ;;  %v57_v1 = vld [vmem:[#allocation4] sm:$0xff]  ;;  %vm79_vm0 = vcmask 7168  }
  0x36   :  { %v59_v2 = vld [vmem:[#allocation6] sm:$0xff]  ;;  %v61_v3 = vsub.f32 %v55_v0, %v57_v1  ;;  %v56_v5 = vld [vmem:[#allocation2 + $0x8] sm:$0xff]  ;;  %v58_v6 = vld [vmem:[#allocation4 + $0x8] sm:$0xff] }
  0x37   :  { %v63_v4 = vsub.f32 %v55_v0, %v59_v2  ;;  %v60_v7 = vld [vmem:[#allocation6 + $0x8] sm:$0xff]  ;;  %v62_v8 = vsub.f32 %v56_v5, %v58_v6 }
  0x38   :  { %v64_v9 = vsub.f32 %v56_v5, %v60_v7  ;;  %v65_v10 = vmul.f32 %v61_v3, %v61_v3 }
  0x39   :  { %v67_v11 = vmul.f32 %v63_v4, %v63_v4  ;;  %v66_v12 = vmul.f32 %v62_v8, %v62_v8 }
  0x3a   :  { %v68_v13 = vmul.f32 %v64_v9, %v64_v9 }
  0x3b   :  { %v69_v14 = vsub.f32 %v65_v10, %v67_v11 }
  0x3c   :  { %v70_v15 = vsub.f32 %v66_v12, %v68_v13 }
  0x3d   :  { %71 = vadd.xlane.f32.xlu0 %v69_v14 }
  0x41   :  { %73 = vadd.xlane.f32.xlu0 %v70_v15 }
  0xca   :  { %v72_v16 = vpop.xlane.xlu0 %71 }
  0xcb   :  { %v75_v17 = vadd.f32 1.0, %v72_v16 }
  0xcd   :  { %v77_v18 = vmax.f32 %v75_v17, 0.0 }
  0xce   :  { %v74_v19 = vpop.xlane.xlu0 %73 }
  0xcf   :  { %80 = vst.msk [vmem:[%s249_s3] sm:$0xff] %vm79_vm0, %v77_v18  ;;  %v76_v20 = vadd.f32 1.0, %v74_v19 }
  0xd1   :  { %v78_v21 = vmax.f32 %v76_v20, 0.0 }
  0xd3   :  { %81 = vst.msk [vmem:[%s249_s3 + $0x8] sm:$0xff] %vm79_vm0, %v78_v21 }
  0xd4   :  { %86 = vsyncpa [#allocation3], 1 }
  0xd5   :  { %87 = vsyncpa [#allocation5], 1 }

</bundles_post_ra>
